<compile_context>
chip_gen: v7x
topology: tpu7x:2x2x1
jax: 0.10.0
libtpu: 0.0.40
codegen_flags: <defaults>
</compile_context>

<pallas_src>
import jax
import jax.numpy as jnp
from jax import lax
from jax.experimental import pallas as pl
from jax.experimental.pallas import tpu as pltpu


def _round_up(a: int, b: int) -> int:
    return (a + b - 1) // b * b


def _round_down_mult(a: int, b: int) -> int:
    return max(b, a // b * b)


def dense_rownorm_kernel(x_ref, w_ref, b_ref, o_ref, acc_ref, ssq_ref):
    # x_ref: (TM, TK)  w_ref: (TK, TN)  (W pre-transposed: K on sublanes)
    # b_ref: (1, TN)   o_ref: (TM, TN)
    # acc_ref: (TM, TN) f32 scratch, ssq_ref: (1, TN) f32 scratch; both resident
    # across the K axis (k is the innermost / fastest grid dim).
    k = pl.program_id(2)

    @pl.when(k == 0)
    def _():
        acc_ref[...] = jnp.zeros_like(acc_ref)
        ssq_ref[...] = jnp.zeros_like(ssq_ref)

    w = w_ref[...]

    # Canonical (M,K)@(K,N) on the MXU, f32 accumulation.
    acc_ref[...] += jnp.dot(x_ref[...], w, preferred_element_type=jnp.float32)

    # Fused row-norm: accumulate sum(W^2) over K in f32 (cheap VPU/XLU work that
    # hides under the MXU).  With bf16 W the squares are computed from the bf16
    # tile but summed in f32.
    wf = w.astype(jnp.float32)
    ssq_ref[...] += jnp.sum(wf * wf, axis=0, keepdims=True)

    @pl.when(k == pl.num_programs(2) - 1)
    def _():
        # TODO(synk): no epsilon for an all-zero weight row (matches the torch
        # reference, which also yields inf).  Padded N columns give 0*inf = NaN
        # in the padded region only; the wrapper slices it off.
        inv = lax.rsqrt(ssq_ref[...])
        o_ref[...] = ((acc_ref[...] + b_ref[...]) * inv).astype(o_ref.dtype)


def my_dense(x, weight, bias, *, mxu_dtype=None, tm=None, tn=None, tk=None):
    """(x @ weight.T + bias) / ||weight_row||_2, matching torch MyDense.forward.

    mxu_dtype: optional narrower dtype (e.g. jnp.bfloat16) fed to the MXU.  This
    is a win on v5e as well as v6e/v7x (bf16-native MXUs, HBM-bound layer); the
    accumulator, the fused row-norm and the epilogue always stay in f32.
    """
    B, Cin = x.shape
    Cout, Cin_w = weight.shape
    assert Cin_w == Cin
    out_dtype = x.dtype
    mat_dtype = jnp.dtype(mxu_dtype) if mxu_dtype is not None else jnp.dtype(x.dtype)
    in_bytes = mat_dtype.itemsize
    out_bytes = jnp.dtype(out_dtype).itemsize

    # M-axis rounding follows the MXU input dtype's sublane packing (8/16/32 rows).
    sub = {4: 8, 2: 16, 1: 32}.get(in_bytes, 8)

    # Large default tiles: the layer is weight-streaming / HBM-bound, so big blocks
    # mean multi-MiB DMAs, fewer ~0.35us grid steps and fewer re-reads of x.
    # Prefer a large TM (W is fully re-streamed M//TM times) before growing TN.
    tm = 256 if tm is None else tm
    tn = 512 if tn is None else tn
    tk = (2048 if in_bytes <= 2 else 1024) if tk is None else tk

    Mp = _round_up(B, sub)
    Np = _round_up(Cout, 128)
    Kp = _round_up(Cin, 128)

    TM = min(_round_up(tm, sub), Mp)
    TN = min(_round_up(tn, 128), Np)
    TK = min(_round_up(tk, 128), Kp)

    # v7x megacore: if the batch collapses to one M block, keep >=2 N blocks so
    # both TensorCores get work via the "parallel" axes (no effect on v5e/v6e).
    if Mp <= TM and Np >= 256:
        TN = min(TN, _round_down_mult(Np // 2, 128))

    # Double-buffered VMEM footprint: inputs + outputs (2-deep pipeline) + resident
    # f32 accumulator + fused-norm scratch + bias.
    def footprint(tm_, tn_, tk_):
        return (2 * (tm_ * tk_ + tk_ * tn_) * in_bytes
                + 2 * tm_ * tn_ * out_bytes
                + tm_ * tn_ * 4
                + tn_ * 4
                + 2 * tn_ * 4)

    # Keep well under v7x's 64 MiB physical VMEM (and other gens' scoped limits);
    # shrink K first, then N, then M if an explicit tile request is too big.
    VMEM_BUDGET = 28 << 20
    while footprint(TM, TN, TK) > VMEM_BUDGET and TK > 128:
        TK = _round_down_mult(TK // 2, 128)
    while footprint(TM, TN, TK) > VMEM_BUDGET and TN > 128:
        TN = _round_down_mult(TN // 2, 128)
    while footprint(TM, TN, TK) > VMEM_BUDGET and TM > sub:
        TM = max(sub, _round_down_mult(TM // 2, sub))

    M = _round_up(B, TM)
    N = _round_up(Cout, TN)
    K = _round_up(Cin, TK)

    # Wrapper touches each big operand exactly once:
    #   x: pad + cast only when actually needed.
    if (B, Cin) == (M, K) and x.dtype == mat_dtype:
        xp = x
    else:
        xp = jnp.zeros((M, K), mat_dtype).at[:B, :Cin].set(x.astype(mat_dtype))

    #   W: one pass doing cast + transpose to (K, N) (+ padding), so the MXU RHS
    #   contracts along sublanes and no per-tile transpose happens in the kernel.
    wt = weight.astype(mat_dtype).T  # (Cin, Cout)
    if (Cin, Cout) == (K, N):
        wp = wt
    else:
        wp = jnp.zeros((K, N), mat_dtype).at[:Cin, :Cout].set(wt)

    bp = jnp.zeros((1, N), jnp.float32).at[0, :Cout].set(bias.astype(jnp.float32))

    grid = (M // TM, N // TN, K // TK)

    cost = pl.CostEstimate(
        flops=2 * M * N * K,
        transcendentals=N,
        bytes_accessed=(M * K + K * N) * in_bytes + M * N * out_bytes + 4 * N,
    )

    out_padded = pl.pallas_call(
        dense_rownorm_kernel,
        out_shape=jax.ShapeDtypeStruct((M, N), out_dtype),
        grid=grid,
        in_specs=[
            pl.BlockSpec((TM, TK), lambda i, j, k: (i, k)),   # x tile
            pl.BlockSpec((TK, TN), lambda i, j, k: (k, j)),   # W^T tile (K-major)
            pl.BlockSpec((1, TN), lambda i, j, k: (0, j)),    # bias
        ],
        out_specs=pl.BlockSpec((TM, TN), lambda i, j, k: (i, j)),
        scratch_shapes=[
            pltpu.VMEM((TM, TN), jnp.float32),   # matmul accumulator
            pltpu.VMEM((1, TN), jnp.float32),    # fused sum-of-squares of W rows
        ],
        compiler_params=pltpu.CompilerParams(
            dimension_semantics=("parallel", "parallel", "arbitrary"),
            # Explicit limit: default scoped VMEM (16 MiB v5e / 32 MiB v6e,v7x) is
            # below what the large tiles may need; <=48 MiB is safe on all gens
            # including v7x's 64 MiB physical VMEM.
            vmem_limit_bytes=48 << 20,
        ),
        cost_estimate=cost,
    )(xp, wp, bp)

    return out_padded[:B, :Cout]


if __name__ == "__main__":
    def ref_dense(x, weight, bias):
        y = jnp.dot(x, weight.T, precision=lax.Precision.HIGHEST) + bias
        return y / jnp.linalg.norm(weight.astype(jnp.float32), axis=1)[None, :]

    # --- small shapes consistent with the module: batch=8, in=32, out=64 ---
    B, Cin, Cout = 8, 32, 64
    kx, kw, kb = jax.random.split(jax.random.PRNGKey(0), 3)
    bound = 1.0 / (Cin ** 0.5)  # torch.nn.Linear default init range
    weight = jax.random.uniform(kw, (Cout, Cin), jnp.float32, -bound, bound)
    bias = jax.random.uniform(kb, (Cout,), jnp.float32, -bound, bound)
    x = jax.random.normal(kx, (B, Cin), jnp.float32)

    ref = ref_dense(x, weight, bias)

    # f32 MXU path.
    out = jax.block_until_ready(my_dense(x, weight, bias))
    assert out.shape == (B, Cout)
    assert jnp.allclose(out, ref, atol=1e-4, rtol=1e-4)

    # bf16 MXU inputs (recommended on v5e/v6e/v7x), f32 accumulate/norm/epilogue.
    out_bf16 = jax.block_until_ready(my_dense(x, weight, bias, mxu_dtype=jnp.bfloat16))
    assert out_bf16.shape == (B, Cout)
    assert jnp.allclose(out_bf16, ref, atol=3e-2, rtol=3e-2)

    # --- multi-block grid exercise: padding + K accumulation + fused norm ---
    B2, Cin2, Cout2 = 64, 512, 384
    kx2, kw2, kb2 = jax.random.split(jax.random.PRNGKey(1), 3)
    bound2 = 1.0 / (Cin2 ** 0.5)
    w2 = jax.random.uniform(kw2, (Cout2, Cin2), jnp.float32, -bound2, bound2)
    b2 = jax.random.uniform(kb2, (Cout2,), jnp.float32, -bound2, bound2)
    x2 = jax.random.normal(kx2, (B2, Cin2), jnp.float32)
    ref2 = ref_dense(x2, w2, b2)
    out2 = jax.block_until_ready(my_dense(x2, w2, b2, tm=32, tn=128, tk=128))
    assert out2.shape == (B2, Cout2)
    assert jnp.allclose(out2, ref2, atol=2e-3, rtol=2e-3)

    print("KERNEL_OK")
</pallas_src>

<mosaic_0001>
module attributes {stable_mosaic.version = 11 : i64} {
  func.func @dense_rownorm_kernel(%arg0: i32, %arg1: i32, %arg2: i32, %arg3: memref<8x128xf32, #tpu.memory_space<vmem>>, %arg4: memref<128x128xf32, #tpu.memory_space<vmem>>, %arg5: memref<1x128xf32, #tpu.memory_space<vmem>>, %arg6: memref<8x128xf32, #tpu.memory_space<vmem>>, %arg7: memref<8x128xf32, #tpu.memory_space<vmem>>, %arg8: memref<1x128xf32, #tpu.memory_space<vmem>>) attributes {dimension_semantics = [#tpu.dimension_semantics<parallel>, #tpu.dimension_semantics<parallel>, #tpu.dimension_semantics<arbitrary>], iteration_bounds = array<i64: 1, 1, 1>, scalar_prefetch = 0 : i64, scratch_operands = 2 : i64, tpu.core_type = #tpu.core_type<tc>, window_params = [{transform_indices = @transform_0, window_bounds = array<i64: 8, 128>}, {transform_indices = @transform_1, window_bounds = array<i64: 128, 128>}, {transform_indices = @transform_2, window_bounds = array<i64: 1, 128>}, {transform_indices = @transform_3, window_bounds = array<i64: 8, 128>}]} {
    %c0_i32 = arith.constant 0 : i32
    %0 = arith.cmpi eq, %arg2, %c0_i32 : i32
    %1 = arith.extui %0 : i1 to i32
    %c0_i32_0 = arith.constant 0 : i32
    %2 = arith.cmpi ne, %1, %c0_i32_0 : i32
    scf.if %2 {
      %cst_15 = arith.constant 0.000000e+00 : f32
      %18 = vector.broadcast %cst_15 : f32 to vector<8x128xf32>
      %c0_16 = arith.constant 0 : index
      %c0_17 = arith.constant 0 : index
      %19 = vector.load %arg7[%c0_16, %c0_17] : memref<8x128xf32, #tpu.memory_space<vmem>>, vector<8x128xf32>
      tpu.vector_store %arg7[%c0_16, %c0_17], %18 {strides = array<i32>} : memref<8x128xf32, #tpu.memory_space<vmem>>, vector<8x128xf32>,
      %cst_18 = arith.constant 0.000000e+00 : f32
      %20 = vector.broadcast %cst_18 : f32 to vector<1x128xf32>
      %c0_19 = arith.constant 0 : index
      %c0_20 = arith.constant 0 : index
      %21 = vector.load %arg8[%c0_19, %c0_20] : memref<1x128xf32, #tpu.memory_space<vmem>>, vector<1x128xf32>
      tpu.vector_store %arg8[%c0_19, %c0_20], %20 {strides = array<i32>} : memref<1x128xf32, #tpu.memory_space<vmem>>, vector<1x128xf32>,
    } else {
    }
    %c0 = arith.constant 0 : index
    %c0_1 = arith.constant 0 : index
    %3 = vector.load %arg4[%c0, %c0_1] : memref<128x128xf32, #tpu.memory_space<vmem>>, vector<128x128xf32>
    %c0_2 = arith.constant 0 : index
    %c0_3 = arith.constant 0 : index
    %4 = vector.load %arg7[%c0_2, %c0_3] : memref<8x128xf32, #tpu.memory_space<vmem>>, vector<8x128xf32>
    %c0_4 = arith.constant 0 : index
    %c0_5 = arith.constant 0 : index
    %5 = vector.load %arg3[%c0_4, %c0_5] : memref<8x128xf32, #tpu.memory_space<vmem>>, vector<8x128xf32>
    %cst = arith.constant dense<0.000000e+00> : vector<8x128xf32>
    %6 = tpu.matmul %5, %3, %cst {dimension_numbers = #tpu.dot_dimension_numbers<[1], [0], [0], [1], [0, 0, 1, 1], [], []>} : vector<8x128xf32>, vector<128x128xf32>, vector<8x128xf32> -> vector<8x128xf32>
    %7 = arith.addf %4, %6 : vector<8x128xf32>
    %c0_6 = arith.constant 0 : index
    %c0_7 = arith.constant 0 : index
    %8 = vector.load %arg7[%c0_6, %c0_7] : memref<8x128xf32, #tpu.memory_space<vmem>>, vector<8x128xf32>
    tpu.vector_store %arg7[%c0_6, %c0_7], %7 {strides = array<i32>} : memref<8x128xf32, #tpu.memory_space<vmem>>, vector<8x128xf32>,
    %c0_8 = arith.constant 0 : index
    %c0_9 = arith.constant 0 : index
    %9 = vector.load %arg8[%c0_8, %c0_9] : memref<1x128xf32, #tpu.memory_space<vmem>>, vector<1x128xf32>
    %10 = arith.mulf %3, %3 : vector<128x128xf32>
    %cst_10 = arith.constant dense<0.000000e+00> : vector<128xf32>
    %11 = vector.multi_reduction <add>, %10, %cst_10 [0] : vector<128x128xf32> to vector<128xf32>
    %12 = vector.shape_cast %11 : vector<128xf32> to vector<1x128xf32>
    %13 = arith.addf %9, %12 : vector<1x128xf32>
    %c0_11 = arith.constant 0 : index
    %c0_12 = arith.constant 0 : index
    %14 = vector.load %arg8[%c0_11, %c0_12] : memref<1x128xf32, #tpu.memory_space<vmem>>, vector<1x128xf32>
    tpu.vector_store %arg8[%c0_11, %c0_12], %13 {strides = array<i32>} : memref<1x128xf32, #tpu.memory_space<vmem>>, vector<1x128xf32>,
    %c0_i32_13 = arith.constant 0 : i32
    %15 = arith.cmpi eq, %arg2, %c0_i32_13 : i32
    %16 = arith.extui %15 : i1 to i32
    %c0_i32_14 = arith.constant 0 : i32
    %17 = arith.cmpi ne, %16, %c0_i32_14 : i32
    scf.if %17 {
      %c0_15 = arith.constant 0 : index
      %c0_16 = arith.constant 0 : index
      %18 = vector.load %arg8[%c0_15, %c0_16] : memref<1x128xf32, #tpu.memory_space<vmem>>, vector<1x128xf32>
      %19 = math.rsqrt %18 : vector<1x128xf32>
      %c0_17 = arith.constant 0 : index
      %c0_18 = arith.constant 0 : index
      %20 = vector.load %arg7[%c0_17, %c0_18] : memref<8x128xf32, #tpu.memory_space<vmem>>, vector<8x128xf32>
      %c0_19 = arith.constant 0 : index
      %c0_20 = arith.constant 0 : index
      %21 = vector.load %arg5[%c0_19, %c0_20] : memref<1x128xf32, #tpu.memory_space<vmem>>, vector<1x128xf32>
      %22 = vector.broadcast %21 : vector<1x128xf32> to vector<8x128xf32>
      %23 = arith.addf %20, %22 : vector<8x128xf32>
      %24 = vector.broadcast %19 : vector<1x128xf32> to vector<8x128xf32>
      %25 = arith.mulf %23, %24 : vector<8x128xf32>
      %c0_21 = arith.constant 0 : index
      %c0_22 = arith.constant 0 : index
      %26 = vector.load %arg6[%c0_21, %c0_22] : memref<8x128xf32, #tpu.memory_space<vmem>>, vector<8x128xf32>
      tpu.vector_store %arg6[%c0_21, %c0_22], %25 {strides = array<i32>} : memref<8x128xf32, #tpu.memory_space<vmem>>, vector<8x128xf32>,
    } else {
    }
    return
  }
  func.func @transform_0(%arg0: i32, %arg1: i32, %arg2: i32) -> (i32, i32) {
    %c0_i32 = arith.constant 0 : i32
    return %arg0, %arg2 : i32, i32
  }
  func.func @transform_1(%arg0: i32, %arg1: i32, %arg2: i32) -> (i32, i32) {
    %c0_i32 = arith.constant 0 : i32
    return %arg2, %arg1 : i32, i32
  }
  func.func @transform_2(%arg0: i32, %arg1: i32, %arg2: i32) -> (i32, i32) {
    %c0_i32 = arith.constant 0 : i32
    %c0_i32_0 = arith.constant 0 : i32
    return %c0_i32, %arg1 : i32, i32
  }
  func.func @transform_3(%arg0: i32, %arg1: i32, %arg2: i32) -> (i32, i32) {
    %c0_i32 = arith.constant 0 : i32
    return %arg0, %arg1 : i32, i32
  }
}

</mosaic_0001>

<bundles_post_ra>
// kernel: tpu_custom_call.1
= control target key start
LH: loop header
LB: loop body
LE: loop exit
PB: predicated region body
PF: predicated region fallthrough
CT: control target
= control target key end

     0   :  { %8 = vsyncpa [#allocation5], 0  ;;  %s456_s0 = inlined_call_operand.hbm [shape: f32[8,128], index: 0, kind: input, shape index: {}]   ;;  %s457_s1 = inlined_call_operand.hbm [shape: f32[128,128], index: 1, kind: input, shape index: {}]   ;;  %s458_s2 = inlined_call_operand.vmem [shape: f32[1,128], index: 2, kind: input, shape index: {}]   ;;  %s459_s3 = inlined_call_operand.hbm [shape: f32[8,128], index: 3, kind: output, shape index: {}]  }
   0x1   :  { %9 = vsyncpa [#allocation8], 0 }
   0x2   :  { %10 = vsyncpa [#allocation6], 0  ;;  %s374_s12 = smov [#allocation4]   ;;  %s375_s14 = smov [#allocation7]  }
   0x3   :  { %s17_s13 = sshll.u32 %s374_s12, 4  ;;  %s26_s15 = sshll.u32 %s375_s14, 4  ;;  %s18_s13 = int_to_ptr.vmem [resolvable:$true] %s17_s13  ;;  %s402_s15 = int_to_ptr.vmem [resolvable:$true] %s26_s15 }
   0x4   :  { %s302_s18 = scalar_lea.hbm %s456_s0, 128 }
   0x5   :  { %p303_p0 = scmp.ne.s32.totalorder %s456_s0, %s302_s18  ;;  %p306_p1 = scmp.lt.u32.totalorder %s302_s18, %s456_s0 }
   0x7   :  { %p308_p2 = pnand %p306_p1, %p303_p0 }
   0x9   :  { %311 = shalt.err (!%p308_p2)
}
   0xa   :  { %s312_s23 = scalar_lea.vmem %s18_s13, 128  ;;  %p317_p4 = scmp.lt.s32.totalorder %s18_s13, %s18_s13 }
   0xb   :  { %p313_p3 = scmp.ne.s32.totalorder %s18_s13, %s312_s23  ;;  %p318_p5 = scmp.lt.s32.totalorder %s312_s23, %s312_s23 }
   0xd   :  { %p319_p6 = por %p318_p5, %p317_p4 }
   0xf   :  { %p320_p7 = pnand %p319_p6, %p313_p3 }
  0x11   :  { %323 = shalt.err (!%p320_p7)
}
  0x12   :  { %20 = dma.hbm_to_vmem [thread:$0]  %s456_s0, 128, %s18_s13, [#allocation5]  }
  0x13   :  { %s324_s28 = scalar_lea.hbm %s457_s1, 2048 }
  0x14   :  { %p325_p8 = scmp.ne.s32.totalorder %s457_s1, %s324_s28  ;;  %p328_p9 = scmp.lt.u32.totalorder %s324_s28, %s457_s1 }
  0x16   :  { %p330_p10 = pnand %p328_p9, %p325_p8 }
  0x18   :  { %333 = shalt.err (!%p330_p10)
}
  0x19   :  { %s334_s6 = scalar_lea.vmem %s402_s15, 2048  ;;  %p339_p12 = scmp.lt.s32.totalorder %s402_s15, %s402_s15 }
  0x1a   :  { %p335_p11 = scmp.ne.s32.totalorder %s402_s15, %s334_s6  ;;  %p340_p13 = scmp.lt.s32.totalorder %s334_s6, %s334_s6 }
  0x1c   :  { %p341_p0 = por %p340_p13, %p339_p12 }
  0x1e   :  { %p342_p1 = pnand %p341_p0, %p335_p11 }
  0x20   :  { %345 = shalt.err (!%p342_p1)
}
  0x21   :  { %s376_s0 = smov 128   ;;  %s377_s7 = smov 8  }
  0x22   :  { %32 = dma.hbm_to_vmem [thread:$0]  %s457_s1, 2048, %s402_s15, [#allocation8], %s376_s0, %s376_s0, %s377_s7  }
  0x23   :  { %368 = dma.done.wait [#allocation5], 128  }
  0x24   :  { %369 = vsyncadd [#allocation5], 4294967168 }
  0x25   :  { %370 = dma.done.wait [#allocation8], 2048  }
  0x26   :  { %371 = vsyncadd [#allocation8], 4294965248  ;;  %v378_v0 = vmov 0.0|0.0   ;;  %v379_v1 = vmov 0.0   ;;  %vm380_vm0 = vmmov 0   ;;  %v47_v2 = vld [vmem:[#allocation7] sm:$0xff] }
  0x27   :  { %268 = vmatprep.subr.bf16.mxu0 %v378_v0  ;;  %46 = vst [vmem:[#allocation3] sm:$0x1] %v379_v1  ;;  %265 = vmatprep.mubr.msk.f32.mxu0 %vm380_vm0, %v379_v1  ;;  %v48_v3 = vld [vmem:[#allocation7 + $0x8] sm:$0xff]  ;;  %v49_v4 = vld [vmem:[#allocation7 + $0x10] sm:$0xff]  ;;  %v138_v6 = vmul.f32 %v47_v2, %v47_v2  ;;  %v50_v8 = vld [vmem:[#allocation7 + $0x18] sm:$0xff]  ;;  %s381_s11 = smov [#allocation9]  }
  0x28   :  { %v269_v5 = vpack.c.bf16 %v48_v3, %v47_v2  ;;  %v139_v7 = vmul.f32 %v48_v3, %v48_v3  ;;  %v140_v9 = vmul.f32 %v49_v4, %v49_v4  ;;  %v272_v11 = vpack.c.bf16 %v50_v8, %v49_v4  ;;  %v51_v13 = vld [vmem:[#allocation7 + $0x20] sm:$0xff]  ;;  %v52_v14 = vld [vmem:[#allocation7 + $0x28] sm:$0xff]  ;;  %v53_v20 = vld [vmem:[#allocation7 + $0x30] sm:$0xff]  ;;  %s205_s12 = sshll.u32 %s381_s11, 4  ;;  %s206_s12 = int_to_ptr.vmem [resolvable:$true] %s205_s12 }
  0x29   :  { %v141_v12 = vmul.f32 %v50_v8, %v50_v8  ;;  %v142_v16 = vmul.f32 %v51_v13, %v51_v13  ;;  %v275_v18 = vpack.c.bf16 %v52_v14, %v51_v13  ;;  %v143_v19 = vmul.f32 %v52_v14, %v52_v14  ;;  %v54_v21 = vld [vmem:[#allocation7 + $0x38] sm:$0xff]  ;;  %v55_v27 = vld [vmem:[#allocation7 + $0x40] sm:$0xff]  ;;  %v56_v28 = vld [vmem:[#allocation7 + $0x48] sm:$0xff]  ;;  %s346_s13 = scalar_lea.vmem %s206_s12, 128  ;;  %p351_p3 = scmp.lt.s32.totalorder %s206_s12, %s206_s12 }
  0x2a   :  { %270 = vmatpush3.bf16.msra.mxu0 %v269_v5  ;;  %v154_v10 = vadd.f32 %v139_v7, %v138_v6  ;;  %v144_v23 = vmul.f32 %v53_v20, %v53_v20  ;;  %v278_v25 = vpack.c.bf16 %v54_v21, %v53_v20  ;;  %v145_v26 = vmul.f32 %v54_v21, %v54_v21  ;;  %v57_v34 = vld [vmem:[#allocation7 + $0x50] sm:$0xff]  ;;  %v58_v35 = vld [vmem:[#allocation7 + $0x58] sm:$0xff]  ;;  %v59_v41 = vld [vmem:[#allocation7 + $0x60] sm:$0xff]  ;;  %p347_p2 = scmp.ne.s32.totalorder %s206_s12, %s346_s13  ;;  %p352_p4 = scmp.lt.s32.totalorder %s346_s13, %s346_s13 }
  0x2b   :  { %271 = vmatprep.subr.bf16.mxu0 %v378_v0  ;;  %v146_v30 = vmul.f32 %v55_v27, %v55_v27  ;;  %v281_v32 = vpack.c.bf16 %v56_v28, %v55_v27  ;;  %v147_v33 = vmul.f32 %v56_v28, %v56_v28  ;;  %v148_v37 = vmul.f32 %v57_v34, %v57_v34  ;;  %v60_v42 = vld [vmem:[#allocation7 + $0x68] sm:$0xff]  ;;  %v61_v48 = vld [vmem:[#allocation7 + $0x70] sm:$0xff]  ;;  %v62_v49 = vld [vmem:[#allocation7 + $0x78] sm:$0xff] }
  0x2c   :  { %v155_v15 = vadd.f32 %v154_v10, %v140_v9  ;;  %v284_v39 = vpack.c.bf16 %v58_v35, %v57_v34  ;;  %v149_v40 = vmul.f32 %v58_v35, %v58_v35  ;;  %v150_v44 = vmul.f32 %v59_v41, %v59_v41  ;;  %v64_v57 = vld [vmem:[#allocation4] sm:$0xff]  ;;  %v215_v7 = vld [vmem:[%s458_s2] ss:$0 sm:$0xff]  ;;  %p353_p5 = por %p352_p4, %p351_p3 }
  0x2d   :  { %v287_v46 = vpack.c.bf16 %v60_v42, %v59_v41  ;;  %v151_v47 = vmul.f32 %v60_v42, %v60_v42  ;;  %v152_v51 = vmul.f32 %v61_v48, %v61_v48  ;;  %v290_v53 = vpack.c.bf16 %v62_v49, %v61_v48 }
  0x2e   :  { %273 = vmatpush3.bf16.msra.mxu0 %v272_v11  ;;  %v156_v17 = vadd.f32 %v155_v15, %v141_v12  ;;  %v153_v54 = vmul.f32 %v62_v49, %v62_v49  ;;  %v137_v63 = vld [vmem:[#allocation3] sm:$0x1]  ;;  %v192_v4 = vlaneseq  ;;  %p354_p6 = pnand %p353_p5, %p347_p2 }
  0x2f   :  { %274 = vmatprep.subr.bf16.mxu0 %v378_v0 }
  0x30   :  { %v157_v22 = vadd.f32 %v156_v17, %v142_v16  ;;  %v193_v5 = vshrl.u32 %v192_v4, 7 }
  0x32   :  { %276 = vmatpush3.bf16.msra.mxu0 %v275_v18  ;;  %v158_v24 = vadd.f32 %v157_v22, %v143_v19  ;;  %v194_v6 = vsub.s32 0, %v193_v5 }
  0x33   :  { %277 = vmatprep.subr.bf16.mxu0 %v378_v0 }
  0x34   :  { %v159_v29 = vadd.f32 %v158_v24, %v144_v23 }
  0x36   :  { %279 = vmatpush3.bf16.msra.mxu0 %v278_v25  ;;  %v160_v31 = vadd.f32 %v159_v29, %v145_v26 }
  0x37   :  { %280 = vmatprep.subr.bf16.mxu0 %v378_v0 }
  0x38   :  { %v161_v36 = vadd.f32 %v160_v31, %v146_v30 }
  0x3a   :  { %282 = vmatpush3.bf16.msra.mxu0 %v281_v32  ;;  %v162_v38 = vadd.f32 %v161_v36, %v147_v33 }
  0x3b   :  { %283 = vmatprep.subr.bf16.mxu0 %v378_v0 }
  0x3c   :  { %v163_v43 = vadd.f32 %v162_v38, %v148_v37 }
  0x3e   :  { %285 = vmatpush3.bf16.msra.mxu0 %v284_v39  ;;  %v164_v45 = vadd.f32 %v163_v43, %v149_v40 }
  0x3f   :  { %286 = vmatprep.subr.bf16.mxu0 %v378_v0 }
  0x40   :  { %v165_v50 = vadd.f32 %v164_v45, %v150_v44 }
  0x42   :  { %288 = vmatpush3.bf16.msra.mxu0 %v287_v46  ;;  %v166_v52 = vadd.f32 %v165_v50, %v151_v47 }
  0x43   :  { %289 = vmatprep.subr.bf16.mxu0 %v378_v0 }
  0x44   :  { %v167_v55 = vadd.f32 %v166_v52, %v152_v51 }
  0x46   :  { %291 = vmatpush3.bf16.msra.mxu0 %v290_v53  ;;  %v168_v56 = vadd.f32 %v167_v55, %v153_v54 }
  0x48   :  { %v169_v58 = vrot.slane %v168_v56, 4 }
  0x49   :  { %266 = vmatmul.mubr.f32.vlgmr.msra.gmra.mrb[0].mxu0 %v64_v57 }
  0x4a   :  { %v170_v59 = vadd.f32 %v169_v58, %v168_v56 }
  0x4c   :  { %v171_v60 = vrot.slane %v170_v59, 2 }
  0x4e   :  { %v172_v61 = vadd.f32 %v171_v60, %v170_v59 }
  0x50   :  { %v173_v62 = vrot.slane %v172_v61, 1 }
  0x52   :  { %v174_v1 = vadd.f32 %v173_v62, %v172_v61 }
  0x54   :  { %v175_v2 = vadd.f32 %v174_v1, %v137_v63 }
  0x56   :  { %176 = vst [vmem:[#allocation3] sm:$0x1] %v175_v2 }
  0x5d   :  { %v180_v3 = vld [vmem:[#allocation3] sm:$0x1] }
  0x5e   :  { %300 = vrsqrt.f32 %v180_v3 }
  0x68   :  { %v301_v0 = vpop.eup %300 }
  0x69   :  { %v195_v8 = vrot.slane %v301_v0, %v194_v6 }
 0x11c   :  { %v131_v9 = vpop.f32.mrb[0].mxu0 }
 0x11d   :  { %v190_v10 = vadd.f32 %v215_v7, %v131_v9  ;;  %v267_v11 = vpop.f32.mrb[1].mxu0 }
 0x11f   :  { %v197_v12 = vmul.f32 %v195_v8, %v190_v10 }
 0x121   :  { %198 = vst [vmem:[#allocation9] sm:$0xff] %v197_v12 }
 0x122   :  { %357 = shalt.err (!%p354_p6)
}
 0x123   :  { %s358_s2 = scalar_lea.hbm %s459_s3, 128 }
 0x124   :  { %p359_p7 = scmp.ne.s32.totalorder %s459_s3, %s358_s2  ;;  %p362_p8 = scmp.lt.u32.totalorder %s358_s2, %s459_s3 }
 0x126   :  { %p364_p9 = pnand %p362_p8, %p359_p7 }
 0x128   :  { %367 = shalt.err (!%p364_p9)
}
 0x129   :  { %208 = dma.vmem_to_hbm [thread:$0]  %s206_s12, 128, %s459_s3, [#allocation6]  }
 0x12a   :  { %372 = dma.done.wait [#allocation6], 128  }
 0x12b   :  { %373 = vsyncadd [#allocation6], 4294967168 }
 0x12c   :  { %212 = vsyncpa [#allocation5], 1 }
 0x12d   :  { %213 = vsyncpa [#allocation8], 1 }
 0x12e   :  { %214 = vsyncpa [#allocation6], 1 }

</bundles_post_ra>
